<compile_context>
chip_gen: v7x
topology: tpu7x:2x2x1
jax: 0.10.0
libtpu: 0.0.40
codegen_flags: <defaults>
</compile_context>

<pallas_src>
import jax
import jax.numpy as jnp
from jax.experimental import pallas as pl
from jax.experimental.pallas import tpu as pltpu


def _matmul_kernel(p_ref, w_ref, o_ref):
    # p_ref: (1, Kp, ts)   im2col patches for one (batch, spatial-tile) block (bf16)
    # w_ref: (Cout, Kp)    folded conv weight (bf16), grid-invariant
    # o_ref: (1, Cout, ts) output block; lane axis = ts (multiple of 128 -> dense stores)
    o_ref[0] = jnp.dot(
        w_ref[...], p_ref[0], preferred_element_type=jnp.float32
    ).astype(o_ref.dtype)


def _vmem_capacity_bytes():
    """Physical VMEM per core; conservative (v7x-sized) default if the query is unavailable."""
    try:
        info = pltpu.get_tpu_info()
        cap = int(getattr(info, "vmem_capacity_bytes", 0))
        if cap > 0:
            return cap
    except Exception:
        pass
    return 64 * 1024 * 1024


def _pick_spatial_tile(hwp, n_batch, cout, kp, in_bytes, out_bytes, tile_budget):
    """Largest multiple of 128 dividing hwp whose double-buffered patch + output tiles fit in
    tile_budget bytes of VMEM.  Then split (for free) until the flattened grid has >= 4 steps
    so pipelining and both v7x TensorCores have work even at tiny shapes."""
    per_col = 2 * kp * in_bytes + 2 * cout * out_bytes   # double-buffered in + out, per position
    max_ts = max(128, tile_budget // per_col)
    best = 128
    t = 128
    limit = min(hwp, max_ts)
    while t <= limit:
        if hwp % t == 0:
            best = t
        t += 128
    while n_batch * (hwp // best) < 4 and best % 256 == 0:
        best //= 2
    return best


def overlap_patch_embed(x, weight, bias=None, *, compute_dtype=jnp.bfloat16, out_dtype=None):
    """x: (N, Cin, H, W); weight: (Cout, Cin, 3, 3); bias: optional (Cout,).
    Matches nn.Conv2d(kernel_size=3, stride=1, padding=1).  Returns (N, Cout, H, W).
    Pass out_dtype=jnp.bfloat16 to halve the dominant output HBM traffic when allowed."""
    N, Cin, H, W = x.shape
    Cout = weight.shape[0]
    HW = H * W
    HWp = -(-HW // 128) * 128             # spatial axis padded to a lane multiple
    K = 9 * Cin
    n_extra = 1 if bias is not None else 0
    Kp = -(-(K + n_extra) // 32) * 32     # contraction axis padded to a sublane multiple

    out_dtype = x.dtype if out_dtype is None else jnp.dtype(out_dtype)
    in_bytes = jnp.dtype(compute_dtype).itemsize
    out_bytes = jnp.dtype(out_dtype).itemsize

    # ---- wrapper-side im2col, built in ONE concatenate (image zero-padding, bias feature,
    #      Kp zero rows and HWp lane padding all fused into the same pass) ------------------
    xp = jnp.pad(x.astype(compute_dtype), ((0, 0), (0, 0), (1, 1), (1, 1)))
    pad_sp = ((0, 0), (0, 0), (0, HWp - HW))
    rows = [
        jnp.pad(xp[:, :, dh:dh + H, dw:dw + W].reshape(N, Cin, HW), pad_sp)
        for dh in range(3) for dw in range(3)
    ]
    if bias is not None:
        rows.append(jnp.ones((N, 1, HWp), compute_dtype))       # constant feature carries bias
    if Kp > K + n_extra:
        rows.append(jnp.zeros((N, Kp - K - n_extra, HWp), compute_dtype))
    patches = jnp.concatenate(rows, axis=1)                      # (N, Kp, HWp), single pass

    # ---- weight: OIHW -> (Cout, kh, kw, cin) -> (Cout, K) -> padded (Cout, Kp) -------------
    w_mat = jnp.transpose(weight, (0, 2, 3, 1)).reshape(Cout, K).astype(compute_dtype)
    w_rows = [w_mat]
    if bias is not None:
        w_rows.append(bias.reshape(Cout, 1).astype(compute_dtype))
    if Kp > K + n_extra:
        w_rows.append(jnp.zeros((Cout, Kp - K - n_extra), compute_dtype))
    w_mat = jnp.concatenate(w_rows, axis=1) if len(w_rows) > 1 else w_mat    # (Cout, Kp)

    # ---- generation-aware VMEM budgets ------------------------------------------------------
    vmem_cap = _vmem_capacity_bytes()
    weight_bytes = Cout * Kp * in_bytes
    tile_budget = min(vmem_cap // 4, 24 * 1024 * 1024) - weight_bytes   # ~16 MiB v7x, 24 MiB v5e/v6e
    vmem_limit = int(min(max(vmem_cap // 2, 32 * 1024 * 1024), 64 * 1024 * 1024))

    ts = _pick_spatial_tile(HWp, N, Cout, Kp, in_bytes, out_bytes, tile_budget)
    grid = (N, HWp // ts)

    cost = pl.CostEstimate(
        flops=2 * N * HW * K * Cout,
        transcendentals=0,
        bytes_accessed=int(N * Kp * HWp * in_bytes
                           + Cout * Kp * in_bytes
                           + N * Cout * HWp * out_bytes),
    )

    def _build(weight_spec):
        return pl.pallas_call(
            _matmul_kernel,
            out_shape=jax.ShapeDtypeStruct((N, Cout, HWp), out_dtype),
            grid_spec=pltpu.PrefetchScalarGridSpec(
                num_scalar_prefetch=0,
                grid=grid,
                in_specs=[
                    pl.BlockSpec((1, Kp, ts), lambda b, s: (b, 0, s)),   # im2col patches
                    weight_spec,                                          # folded weight
                ],
                out_specs=pl.BlockSpec((1, Cout, ts), lambda b, s: (b, 0, s)),
            ),
            compiler_params=pltpu.CompilerParams(
                dimension_semantics=("parallel", "parallel"),
                vmem_limit_bytes=vmem_limit,
            ),
            cost_estimate=cost,
        )

    w_idx = lambda b, s: (0, 0)
    try:
        # Grid-invariant weight: keep a single VMEM copy (no double buffer) to preserve
        # VMEM headroom for larger spatial tiles (matters for bigger Cin/Cout stages, v7x).
        w_spec = pl.BlockSpec((Cout, Kp), w_idx, pipeline_mode=pl.Buffered(1))
        out_flat = _build(w_spec)(patches, w_mat)
    except Exception:
        out_flat = _build(pl.BlockSpec((Cout, Kp), w_idx))(patches, w_mat)

    if HWp != HW:
        out_flat = out_flat[:, :, :HW]
    # Free (metadata-only) reshape back to NCHW — no transpose pass needed.
    return out_flat.reshape(N, Cout, H, W)


if __name__ == "__main__":
    # Module defaults: in_c=3, embed_dim=48, bias=False.  Small deterministic inputs.
    key = jax.random.PRNGKey(0)
    k_x, k_w = jax.random.split(key)

    N, Cin, H, W = 2, 3, 16, 16
    Cout = 48

    x = jax.random.normal(k_x, (N, Cin, H, W), dtype=jnp.float32)
    fan_in = Cin * 3 * 3
    weight = jax.random.normal(k_w, (Cout, Cin, 3, 3), dtype=jnp.float32) * (fan_in ** -0.5)

    out = overlap_patch_embed(x, weight)          # bias=False path (module default)
    out = jax.block_until_ready(out)

    # Reference on the same bf16-rounded operands (kernel does bf16 x bf16 -> f32 accumulate;
    # bf16 products are exact in f32, so only summation order differs).
    xb = x.astype(jnp.bfloat16).astype(jnp.float32)
    wb = weight.astype(jnp.bfloat16).astype(jnp.float32)
    ref = jax.lax.conv_general_dilated(
        xb, wb, window_strides=(1, 1), padding=((1, 1), (1, 1)),
        dimension_numbers=("NCHW", "OIHW", "NCHW"))

    assert out.shape == (N, Cout, H, W)
    assert out.dtype == x.dtype
    assert jnp.allclose(out, ref, atol=1e-3, rtol=1e-3), float(jnp.max(jnp.abs(out - ref)))

    print("KERNEL_OK")
</pallas_src>

<mosaic_0001>
module attributes {stable_mosaic.version = 11 : i64} {
  func.func @_matmul_kernel(%arg0: i32, %arg1: i32, %arg2: memref<1x32x128xbf16, #tpu.memory_space<vmem>>, %arg3: memref<48x32xbf16, #tpu.memory_space<vmem>>, %arg4: memref<1x48x128xf32, #tpu.memory_space<vmem>>) attributes {dimension_semantics = [#tpu.dimension_semantics<parallel>, #tpu.dimension_semantics<parallel>], iteration_bounds = array<i64: 2, 2>, scalar_prefetch = 0 : i64, scratch_operands = 0 : i64, tpu.core_type = #tpu.core_type<tc>, window_params = [{transform_indices = @transform_0, window_bounds = array<i64: 1, 32, 128>}, {pipeline_mode = #tpu.pipeline_mode<synchronous>, transform_indices = @transform_1, window_bounds = array<i64: 48, 32>}, {transform_indices = @transform_2, window_bounds = array<i64: 1, 48, 128>}]} {
    %c0 = arith.constant 0 : index
    %c0_0 = arith.constant 0 : index
    %0 = vector.load %arg3[%c0, %c0_0] : memref<48x32xbf16, #tpu.memory_space<vmem>>, vector<48x32xbf16>
    %c0_1 = arith.constant 0 : index
    %c0_2 = arith.constant 0 : index
    %c0_3 = arith.constant 0 : index
    %1 = vector.load %arg2[%c0_1, %c0_2, %c0_3] : memref<1x32x128xbf16, #tpu.memory_space<vmem>>, vector<1x32x128xbf16>
    %2 = vector.shape_cast %1 : vector<1x32x128xbf16> to vector<32x128xbf16>
    %cst = arith.constant dense<0.000000e+00> : vector<48x128xf32>
    %3 = tpu.matmul %0, %2, %cst {dimension_numbers = #tpu.dot_dimension_numbers<[1], [0], [0], [1], [0, 0, 1, 1], [], []>} : vector<48x32xbf16>, vector<32x128xbf16>, vector<48x128xf32> -> vector<48x128xf32>
    %c0_4 = arith.constant 0 : index
    %c0_5 = arith.constant 0 : index
    %c0_6 = arith.constant 0 : index
    %4 = vector.load %arg4[%c0_4, %c0_5, %c0_6] : memref<1x48x128xf32, #tpu.memory_space<vmem>>, vector<1x48x128xf32>
    %5 = vector.shape_cast %4 : vector<1x48x128xf32> to vector<48x128xf32>
    %6 = vector.shape_cast %3 : vector<48x128xf32> to vector<1x48x128xf32>
    tpu.vector_store %arg4[%c0_4, %c0_5, %c0_6], %6 {strides = array<i32>} : memref<1x48x128xf32, #tpu.memory_space<vmem>>, vector<1x48x128xf32>,
    return
  }
  func.func @transform_0(%arg0: i32, %arg1: i32) -> (i32, i32, i32) {
    %c0_i32 = arith.constant 0 : i32
    %c0_i32_0 = arith.constant 0 : i32
    return %arg0, %c0_i32, %arg1 : i32, i32, i32
  }
  func.func @transform_1(%arg0: i32, %arg1: i32) -> (i32, i32) {
    %c0_i32 = arith.constant 0 : i32
    %c0_i32_0 = arith.constant 0 : i32
    %c0_i32_1 = arith.constant 0 : i32
    return %c0_i32, %c0_i32_0 : i32, i32
  }
  func.func @transform_2(%arg0: i32, %arg1: i32) -> (i32, i32, i32) {
    %c0_i32 = arith.constant 0 : i32
    %c0_i32_0 = arith.constant 0 : i32
    return %arg0, %c0_i32, %arg1 : i32, i32, i32
  }
}

module attributes {stable_mosaic.version = 11 : i64} {
  func.func @_matmul_kernel(%arg0: i32, %arg1: i32, %arg2: memref<1x32x128xbf16, #tpu.memory_space<vmem>>, %arg3: memref<48x32xbf16, #tpu.memory_space<vmem>>, %arg4: memref<1x48x128xf32, #tpu.memory_space<vmem>>) attributes {dimension_semantics = [#tpu.dimension_semantics<parallel>, #tpu.dimension_semantics<parallel>], iteration_bounds = array<i64: 2, 2>, scalar_prefetch = 0 : i64, scratch_operands = 0 : i64, tpu.core_type = #tpu.core_type<tc>, window_params = [{transform_indices = @transform_0, window_bounds = array<i64: 1, 32, 128>}, {pipeline_mode = #tpu.pipeline_mode<synchronous>, transform_indices = @transform_1, window_bounds = array<i64: 48, 32>}, {transform_indices = @transform_2, window_bounds = array<i64: 1, 48, 128>}]} {
    %c0 = arith.constant 0 : index
    %c0_0 = arith.constant 0 : index
    %0 = vector.load %arg3[%c0, %c0_0] : memref<48x32xbf16, #tpu.memory_space<vmem>>, vector<48x32xbf16>
    %c0_1 = arith.constant 0 : index
    %c0_2 = arith.constant 0 : index
    %c0_3 = arith.constant 0 : index
    %1 = vector.load %arg2[%c0_1, %c0_2, %c0_3] : memref<1x32x128xbf16, #tpu.memory_space<vmem>>, vector<1x32x128xbf16>
    %2 = vector.shape_cast %1 : vector<1x32x128xbf16> to vector<32x128xbf16>
    %cst = arith.constant dense<0.000000e+00> : vector<48x128xf32>
    %3 = tpu.matmul %0, %2, %cst {dimension_numbers = #tpu.dot_dimension_numbers<[1], [0], [0], [1], [0, 0, 1, 1], [], []>} : vector<48x32xbf16>, vector<32x128xbf16>, vector<48x128xf32> -> vector<48x128xf32>
    %c0_4 = arith.constant 0 : index
    %c0_5 = arith.constant 0 : index
    %c0_6 = arith.constant 0 : index
    %4 = vector.load %arg4[%c0_4, %c0_5, %c0_6] : memref<1x48x128xf32, #tpu.memory_space<vmem>>, vector<1x48x128xf32>
    %5 = vector.shape_cast %4 : vector<1x48x128xf32> to vector<48x128xf32>
    %6 = vector.shape_cast %3 : vector<48x128xf32> to vector<1x48x128xf32>
    tpu.vector_store %arg4[%c0_4, %c0_5, %c0_6], %6 {strides = array<i32>} : memref<1x48x128xf32, #tpu.memory_space<vmem>>, vector<1x48x128xf32>,
    return
  }
  func.func @transform_0(%arg0: i32, %arg1: i32) -> (i32, i32, i32) {
    %c0_i32 = arith.constant 0 : i32
    %c0_i32_0 = arith.constant 0 : i32
    return %arg0, %c0_i32, %arg1 : i32, i32, i32
  }
  func.func @transform_1(%arg0: i32, %arg1: i32) -> (i32, i32) {
    %c0_i32 = arith.constant 0 : i32
    %c0_i32_0 = arith.constant 0 : i32
    %c0_i32_1 = arith.constant 0 : i32
    return %c0_i32, %c0_i32_0 : i32, i32
  }
  func.func @transform_2(%arg0: i32, %arg1: i32) -> (i32, i32, i32) {
    %c0_i32 = arith.constant 0 : i32
    %c0_i32_0 = arith.constant 0 : i32
    return %arg0, %c0_i32, %arg1 : i32, i32, i32
  }
}

</mosaic_0001>

<bundles_post_ra>
// kernel: tpu_custom_call.1
= control target key start
LH: loop header
LB: loop body
LE: loop exit
PB: predicated region body
PF: predicated region fallthrough
CT: control target
= control target key end

     0   :  { %7 = vsyncpa [#allocation3], 0  ;;  %s894_s0 = inlined_call_operand.hbm [shape: bf16[2,32,256], index: 0, kind: input, shape index: {}]   ;;  %s895_s1 = inlined_call_operand.vmem [shape: bf16[48,32], index: 1, kind: input, shape index: {}]   ;;  %s896_s2 = inlined_call_operand.hbm [shape: f32[2,48,256], index: 2, kind: output, shape index: {}]  }
   0x1   :  { %9 = vsyncpa [#allocation3 + $0x1], 0 }
   0x2   :  { %10 = vsyncpa [#allocation4], 0 }
   0x3   :  { %12 = vsyncpa [#allocation4 + $0x1], 0  ;;  %s686_s9 = smov 0   ;;  %s688_s10 = smov 0  }
   0x4   :  { %s690_s11 = smov 0   ;;  %s692_s12 = smov 0  }
   0x5   :  { %s694_s13 = smov 0   ;;  %s696_s14 = smov 0  }
   0x6   :  { %s698_s15 = smov 0   ;;  %s700_s16 = smov 0  }
   0x7 LB: > { %s393_s17 = sadd.s32 4294967295, %s659_s16   ;;  %s394_s18 = sadd.s32 4294967294, %s659_s16   ;;  %s659_s16 = sphi %s700_s16, %s18_s16   ;;  %s655_s15 = sphi %s698_s15, %s911_s15   ;;  %s651_s14 = sphi %s696_s14, %s910_s14   ;;  %s647_s13 = sphi %s694_s13, %s909_s13   ;;  %s643_s12 = sphi %s692_s12, %s908_s12   ;;  %s639_s11 = sphi %s690_s11, %s907_s11   ;;  %s635_s10 = sphi %s688_s10, %s906_s10   ;;  %s631_s9 = sphi %s686_s9, %s905_s9  }
   0x8   : > { %s27_s19 = sadd.s32 1, %s651_s14  ;;  %s30_s20 = sadd.s32 1, %s655_s15 }
   0x9   : > { %p28_p0 = scmp.ge.s32.totalorder %s27_s19, 2  ;;  %s39_s21 = sadd.s32 1, %s639_s11 }
   0xa   : > { %p46_p1 = scmp.ne.s32.totalorder %s639_s11, %s635_s10  ;;  %p47_p2 = scmp.eq.s32.totalorder %s659_s16, 0 }
   0xb   : > { %s913_s19 = smov (%p28_p0, %s27_s19), 0  ;;  %s915_s20 = smov (!%p28_p0, %s30_s20), %s655_s15 }
   0xc   : > { %s35_s22 = ssub.s32 %s651_s14, %s913_s19  ;;  %p739_p3 = por %p47_p2, %p46_p1 }
   0xd   : > { %p32_p4 = scmp.ge.s32.totalorder %s915_s20, 2  ;;  %p52_p5 = scmp.ne.s32.totalorder %s635_s10, %s631_s9 }
   0xe   : > { %p53_p6 = scmp.eq.s32.totalorder %s393_s17, 0  ;;  %p99_p7 = scmp.eq.s32.totalorder %s393_s17, 3 }
   0xf   : > { %s917_s20 = smov (%p32_p4, %s915_s20), 0  ;;  %p105_p10 = scmp.eq.s32.totalorder %s394_s18, 3 }
  0x10   : > { %p747_p8 = por %p53_p6, %p52_p5  ;;  %p751_p9 = por %p99_p7, %p46_p1 }
  0x11   : > { %s34_s26 = ssub.s32 %s655_s15, %s917_s20  ;;  %p757_p12 = por %p105_p10, %p52_p5 }
  0x12   : > { %s900_s25 = scalar_select %p751_p9, 1, 0 }
  0x13   : > { %s36_s27 = sor.u32 %s35_s22, %s34_s26  ;;  %p452_p13 = scmp.lt.s32.totalorder %s659_s16, 4 }
  0x14   : > { %p37_p11 = scmp.eq.s32.totalorder %s36_s27, 0  ;;  %s128_s29 = sand.u32 1, %s639_s11  }
  0x15   : > { %s901_s28 = scalar_select %p757_p12, 1, 0 }
  0x16   : > { %s764_s30 = scalar_select %p37_p11, %s639_s11, %s39_s21  }
  0x17   : > { %s397_s3 = sshll.u32 %s128_s29, 4  ;;  %s398_s4 = sshll.u32 %s655_s15, 3 }
  0x18   : > { %s137_s5 = sadd.s32 %s651_s14, %s398_s4  ;;  %s132_s6 = scalar_lea.vmem [#allocation2], %s397_s3 }
  0x19   : > { %s140_s7 = sshll.u32 %s132_s6, 4  ;;  %s399_s8 = sshll.u32 %s137_s5, 6  ;;  %s768_s7 = int_to_ptr.vmem [resolvable:$true] %s140_s7 }
  0x1a   : > { %s773_s22 = scalar_lea.hbm %s894_s0, %s399_s8  ;;  %p777_p0 = pnand %p452_p13, %p739_p3 }
  0x1b   : > { %s781_s26 = scalar_lea.sflag [#allocation3], %s128_s29  ;;  %s531_s27 = scalar_lea.hbm %s773_s22, 256 }
  0x1c   : > { %p532_p1 = scmp.ne.s32.totalorder %s773_s22, %s531_s27  ;;  %p533_p2 = pneg %p777_p0 }
  0x1d   : > { %s536_s4 = scalar_lea.hbm %s894_s0, 1024  ;;  %p537_p3 = scmp.lt.u32.totalorder %s773_s22, %s894_s0 }
  0x1e   : > { %p534_p4 = pnand %p533_p2, %p532_p1  ;;  %p538_p6 = scmp.lt.u32.totalorder %s536_s4, %s531_s27 }
  0x1f   : > { %p540_p10 = scmp.lt.u32.totalorder %s531_s27, %s773_s22 }
  0x20   : > { %p535_p5 = pneg %p534_p4  ;;  %p539_p7 = por %p538_p6, %p537_p3 }
  0x22   : > { %p541_p11 = por %p540_p10, %p539_p7 }
  0x24   : > { %p542_p13 = pnand %p541_p11, %p535_p5 }
  0x26   : > { %545 = shalt.err (!%p542_p13)
}
  0x27   : > { %s546_s29 = scalar_lea.vmem %s768_s7, 256  ;;  %s661_s8 = smov [#allocation2]  }
  0x28   : > { %p547_p1 = scmp.ne.s32.totalorder %s768_s7, %s546_s29  ;;  %s551_s17 = sshll.u32 %s661_s8, 4  ;;  %s552_s17 = int_to_ptr.vmem [resolvable:$false] %s551_s17 }
  0x29   : > { %s553_s18 = scalar_lea.vmem %s552_s17, 512  ;;  %p554_p9 = scmp.lt.s32.totalorder %s768_s7, %s552_s17 }
  0x2a   : > { %p549_p4 = pnand %p547_p1, %p533_p2  ;;  %p555_p3 = scmp.lt.s32.totalorder %s553_s18, %s546_s29 }
  0x2c   : > { %p550_p12 = pneg %p549_p4  ;;  %p556_p6 = por %p555_p3, %p554_p9 }
  0x2e   : > { %p557_p7 = pnand %p556_p6, %p550_p12 }
  0x30   : > { %560 = shalt.err (!%p557_p7)
}
  0x31   : > { %s662_s27 = smov 128   ;;  %s663_s23 = smov 64  }
  0x32   : > { %s664_s3 = smov 4   ;;  %p400_p2 = scmp.ge.s32.totalorder %s659_s16, 1 }
  0x33   : > { %447 = dma.hbm_to_vmem [thread:$0]  (!%p777_p0), %s773_s22, 256, %s768_s7, %s781_s26, %s662_s27, %s663_s23, %s664_s3  }
  0x34   : > { %p148_p5 = scmp.lt.s32.totalorder %s659_s16, 5 }
  0x36   : > { %p149_p10 = pnand %p400_p2, %p148_p5 }
  0x37   : > { %s812_s4 = sand.u32 (!%p149_p10), 1, %s635_s10  }
  0x38   : > { %152 = sbr.rel (%p149_p10) target bundleno = 312 (0x138), region = 28  ;;  %s401_s5 = sshll.u32 (!%p149_p10), %s812_s4, 4 }
  0x39   : > { %s155_s6 = scalar_lea.sflag (!%p149_p10), [#allocation3], %s812_s4  ;;  %s158_s29 = scalar_lea.vmem (!%p149_p10), [#allocation2], %s401_s5 }
  0x3f   : > { %622 = dma.done.wait (%p747_p8), %s155_s6, 256  }
  0x40   : > { %624 = vsyncadd (%p747_p8), %s155_s6, 4294967040  ;;  %v665_v0 = vmov 0.0   ;;  %vm666_vm0 = vmmov 0   ;;  %v526_v1 = vld [vmem:[%s158_s29] sm:$0xff]   ;;  %v527_v2 = vld [vmem:[%s158_s29 + $0x8] sm:$0xff]   ;;  %vm217_vm1 = vcmask 261120  }
  0x41   : > { %434 = vmatprep.subr.bf16.mxu1 %v665_v0  ;;  %418 = vmatprep.subr.bf16.mxu0 %v665_v0  ;;  %v528_v3 = vld [vmem:[%s895_s1 + $0x8] sm:$0xff]   ;;  %v529_v4 = vld [vmem:[%s895_s1] sm:$0xff]   ;;  %v530_v5 = vld [vmem:[%s895_s1 + $0x10] sm:$0xff]   ;;  %s438_s17 = smul.u32 48, %s812_s4  ;;  %p903_p9 = scmp.ne.s32.totalorder %s900_s25, 0 }
  0x42   : > { %426 = vmatprep.mubr.msk.bf16.mxu1 %vm666_vm0, %v665_v0  ;;  %422 = vmatprep.mubr.msk.bf16.mxu0 %vm666_vm0, %v665_v0  ;;  %s439_s18 = smul.u32 12, %s647_s13  ;;  %s667_s22 = smov [#allocation5]  }
  0x43   : > { %436 = vmatpush3.bf16.msra.mxu1 %v526_v1  ;;  %419 = vmatpush3.bf16.msra.mxu0 %v526_v1  ;;  %s178_s27 = scalar_lea.vmem [#allocation5], %s438_s17  ;;  %s565_s24 = sshll.u32 %s667_s22, 4  ;;  %s566_s24 = int_to_ptr.vmem [resolvable:$false] %s565_s24 }
  0x44   : > { %435 = vmatprep.subr.bf16.mxu1 %v665_v0  ;;  %420 = vmatprep.subr.bf16.mxu0 %v665_v0  ;;  %s302_s23 = sadd.s32 %s643_s12, %s439_s18  ;;  %s305_s3 = sshll.u32 %s178_s27, 4  ;;  %s835_s3 = int_to_ptr.vmem [resolvable:$true] %s305_s3 }
  0x45   : > { %s410_s5 = sshll.u32 %s302_s23, 7  ;;  %s291_s12 = scalar_lea.sflag [#allocation4], %s812_s4 }
  0x46   : > { %s840_s29 = scalar_lea.hbm %s896_s2, %s410_s5  ;;  %s561_s7 = scalar_lea.vmem %s835_s3, 768 }
  0x47   : > { %437 = vmatpush3.bf16.msra.mxu1 %v527_v2  ;;  %421 = vmatpush3.bf16.msra.mxu0 %v527_v2  ;;  %p562_p8 = scmp.ne.s32.totalorder %s835_s3, %s561_s7  ;;  %s567_s21 = scalar_lea.vmem %s566_s24, 1536 }
  0x48   : > { %p568_p11 = scmp.lt.s32.totalorder %s835_s3, %s566_s24  ;;  %p569_p13 = scmp.lt.s32.totalorder %s567_s21, %s561_s7 }
  0x49   : > { %p563_p12 = pnand %p562_p8, %p903_p9 }
  0x4a   : > { %427 = vmatmul.mubr.msk.bf16.vlgmr.msra.gmra.mrb[0].mxu1 %vm217_vm1, %v528_v3  ;;  %423 = vmatmul.mubr.msk.bf16.vlgmr.msra.gmra.mrb[0].mxu0 %vm217_vm1, %v529_v4  ;;  %p570_p1 = por %p569_p13, %p568_p11 }
  0x4b   : > { %430 = vmatprep.mubr.msk.bf16.mxu1 %vm666_vm0, %v665_v0  ;;  %p564_p0 = pneg %p563_p12 }
  0x4d   : > { %p571_p4 = pnand %p570_p1, %p564_p0 }
  0x52   : > { %431 = vmatmul.mubr.msk.bf16.gmra.mrb[4].mxu1 %vm217_vm1, %v530_v5 }
 0x11d   : > { %v269_v6 = vpop.f32.mrb[0].mxu1  ;;  %v261_v7 = vpop.f32.mrb[0].mxu0 }
 0x11e   : > { %286 = vst [vmem:[%s178_s27 + $0x10] sm:$0xff] %v269_v6  ;;  %v428_v8 = vpop.f32.mrb[1].mxu1  ;;  %284 = vst [vmem:[%s178_s27] sm:$0xff] %v261_v7  ;;  %v424_v9 = vpop.f32.mrb[1].mxu0 }
 0x11f   : > { %v272_v10 = vpop.f32.mrb[2].mxu1  ;;  %v264_v11 = vpop.f32.mrb[2].mxu0 }
 0x120   : > { %287 = vst [vmem:[%s178_s27 + $0x18] sm:$0xff] %v272_v10  ;;  %v429_v12 = vpop.f32.mrb[3].mxu1  ;;  %285 = vst [vmem:[%s178_s27 + $0x8] sm:$0xff] %v264_v11  ;;  %v425_v13 = vpop.f32.mrb[3].mxu0 }
 0x125   : > { %v277_v14 = vpop.f32.mrb[4].mxu1 }
 0x126   : > { %288 = vst [vmem:[%s178_s27 + $0x20] sm:$0xff] %v277_v14  ;;  %v432_v15 = vpop.f32.mrb[5].mxu1 }
 0x127   : > { %v280_v16 = vpop.f32.mrb[6].mxu1 }
 0x128   : > { %289 = vst [vmem:[%s178_s27 + $0x28] sm:$0xff] %v280_v16  ;;  %v433_v17 = vpop.f32.mrb[7].mxu1 }
 0x129   : > { %574 = shalt.err (!%p571_p4)
}
 0x12a   : > { %s575_s26 = scalar_lea.hbm %s840_s29, 768  ;;  %s579_s18 = scalar_lea.hbm %s896_s2, 3072 }
 0x12b   : > { %p576_p3 = scmp.ne.s32.totalorder %s840_s29, %s575_s26  ;;  %p580_p2 = scmp.lt.u32.totalorder %s840_s29, %s896_s2 }
 0x12c   : > { %p581_p5 = scmp.lt.u32.totalorder %s579_s18, %s575_s26  ;;  %p583_p8 = scmp.lt.u32.totalorder %s575_s26, %s840_s29 }
 0x12d   : > { %p577_p6 = pnand %p576_p3, %p903_p9 }
 0x12e   : > { %p582_p10 = por %p581_p5, %p580_p2 }
 0x12f   : > { %p578_p7 = pneg %p577_p6 }
 0x130   : > { %p584_p12 = por %p583_p8, %p582_p10 }
 0x132   : > { %p585_p0 = pnand %p584_p12, %p578_p7 }
 0x134   : > { %588 = shalt.err (!%p585_p0)
}
 0x135   : > { %s668_s5 = smov 128   ;;  %s669_s13 = smov 256  }
 0x136   : > { %s670_s6 = smov 8  }
 0x137   : > { %442 = dma.vmem_to_hbm [thread:$0]  (%p903_p9), %s835_s3, 768, %s840_s29, %s291_s12, %s668_s5, %s669_s13, %s670_s6  }
 0x138 PF: > { %p453_p11 = scmp.ge.s32.totalorder %s659_s16, 2  ;;  %s320_s7 = sand.u32 1, %s631_s9  }
 0x139   : > { %p904_p13 = scmp.ne.s32.totalorder %s901_s28, 0  ;;  %s321_s22 = scalar_lea.sflag [#allocation4], %s320_s7 }
 0x13b   : > { %p449_p1 = pnand %p453_p11, %p904_p13 }
 0x13d   : > { %626 = dma.done.wait (!%p449_p1), %s321_s22, 768  }
 0x13e   : > { %628 = vsyncadd (!%p449_p1), %s321_s22, 4294966528  ;;  %s18_s16 = sadd.s32 1, %s659_s16   ;;  %s905_s9 = smov %s635_s10 }
 0x13f   : > { %p15_p4 = scmp.ge.s32.totalorder %s18_s16, 6   ;;  %s906_s10 = smov %s639_s11 }
 0x140   : > { %s907_s11 = smov %s764_s30  ;;  %s908_s12 = smov %s651_s14 }
 0x141   : > { %s909_s13 = smov %s655_s15  ;;  %s910_s14 = smov %s913_s19 }
 0x142   : > { %s911_s15 = smov %s917_s20  ;;  %17 = sbr.rel (!%p15_p4) target bundleno = 7 (0x7), region = 73 }
 0x149   :  { %326 = vsyncpa [#allocation3], 1 }
 0x14a   :  { %328 = vsyncpa [#allocation3 + $0x1], 1 }
 0x14b   :  { %329 = vsyncpa [#allocation4], 1 }
 0x14c   :  { %331 = vsyncpa [#allocation4 + $0x1], 1 }

// kernel: tpu_custom_call.1
= control target key start
LH: loop header
LB: loop body
LE: loop exit
PB: predicated region body
PF: predicated region fallthrough
CT: control target
= control target key end

     0   :  { %7 = vsyncpa [#allocation3], 0  ;;  %s894_s0 = inlined_call_operand.hbm [shape: bf16[2,32,256], index: 0, kind: input, shape index: {}]   ;;  %s895_s1 = inlined_call_operand.vmem [shape: bf16[48,32], index: 1, kind: input, shape index: {}]   ;;  %s896_s2 = inlined_call_operand.hbm [shape: f32[2,48,256], index: 2, kind: output, shape index: {}]  }
   0x1   :  { %9 = vsyncpa [#allocation3 + $0x1], 0 }
   0x2   :  { %10 = vsyncpa [#allocation4], 0 }
   0x3   :  { %12 = vsyncpa [#allocation4 + $0x1], 0  ;;  %s686_s9 = smov 0   ;;  %s688_s10 = smov 0  }
   0x4   :  { %s690_s11 = smov 0   ;;  %s692_s12 = smov 0  }
   0x5   :  { %s694_s13 = smov 0   ;;  %s696_s14 = smov 0  }
   0x6   :  { %s698_s15 = smov 0   ;;  %s700_s16 = smov 0  }
   0x7 LB: > { %s393_s17 = sadd.s32 4294967295, %s659_s16   ;;  %s394_s18 = sadd.s32 4294967294, %s659_s16   ;;  %s659_s16 = sphi %s700_s16, %s18_s16   ;;  %s655_s15 = sphi %s698_s15, %s911_s15   ;;  %s651_s14 = sphi %s696_s14, %s910_s14   ;;  %s647_s13 = sphi %s694_s13, %s909_s13   ;;  %s643_s12 = sphi %s692_s12, %s908_s12   ;;  %s639_s11 = sphi %s690_s11, %s907_s11   ;;  %s635_s10 = sphi %s688_s10, %s906_s10   ;;  %s631_s9 = sphi %s686_s9, %s905_s9  }
   0x8   : > { %s27_s19 = sadd.s32 1, %s651_s14  ;;  %s30_s20 = sadd.s32 1, %s655_s15 }
   0x9   : > { %p28_p0 = scmp.ge.s32.totalorder %s27_s19, 2  ;;  %s39_s21 = sadd.s32 1, %s639_s11 }
   0xa   : > { %p46_p1 = scmp.ne.s32.totalorder %s639_s11, %s635_s10  ;;  %p47_p2 = scmp.eq.s32.totalorder %s659_s16, 0 }
   0xb   : > { %s913_s19 = smov (%p28_p0, %s27_s19), 0  ;;  %s915_s20 = smov (!%p28_p0, %s30_s20), %s655_s15 }
   0xc   : > { %s35_s22 = ssub.s32 %s651_s14, %s913_s19  ;;  %p739_p3 = por %p47_p2, %p46_p1 }
   0xd   : > { %p32_p4 = scmp.ge.s32.totalorder %s915_s20, 2  ;;  %p52_p5 = scmp.ne.s32.totalorder %s635_s10, %s631_s9 }
   0xe   : > { %p53_p6 = scmp.eq.s32.totalorder %s393_s17, 0  ;;  %p99_p7 = scmp.eq.s32.totalorder %s393_s17, 3 }
   0xf   : > { %s917_s20 = smov (%p32_p4, %s915_s20), 0  ;;  %p105_p10 = scmp.eq.s32.totalorder %s394_s18, 3 }
  0x10   : > { %p747_p8 = por %p53_p6, %p52_p5  ;;  %p751_p9 = por %p99_p7, %p46_p1 }
  0x11   : > { %s34_s26 = ssub.s32 %s655_s15, %s917_s20  ;;  %p757_p12 = por %p105_p10, %p52_p5 }
  0x12   : > { %s900_s25 = scalar_select %p751_p9, 1, 0 }
  0x13   : > { %s36_s27 = sor.u32 %s35_s22, %s34_s26  ;;  %p452_p13 = scmp.lt.s32.totalorder %s659_s16, 4 }
  0x14   : > { %p37_p11 = scmp.eq.s32.totalorder %s36_s27, 0  ;;  %s128_s29 = sand.u32 1, %s639_s11  }
  0x15   : > { %s901_s28 = scalar_select %p757_p12, 1, 0 }
  0x16   : > { %s764_s30 = scalar_select %p37_p11, %s639_s11, %s39_s21  }
  0x17   : > { %s397_s3 = sshll.u32 %s128_s29, 4  ;;  %s398_s4 = sshll.u32 %s655_s15, 3 }
  0x18   : > { %s137_s5 = sadd.s32 %s651_s14, %s398_s4  ;;  %s132_s6 = scalar_lea.vmem [#allocation2], %s397_s3 }
  0x19   : > { %s140_s7 = sshll.u32 %s132_s6, 4  ;;  %s399_s8 = sshll.u32 %s137_s5, 6  ;;  %s768_s7 = int_to_ptr.vmem [resolvable:$true] %s140_s7 }
  0x1a   : > { %s773_s22 = scalar_lea.hbm %s894_s0, %s399_s8  ;;  %p777_p0 = pnand %p452_p13, %p739_p3 }
  0x1b   : > { %s781_s26 = scalar_lea.sflag [#allocation3], %s128_s29  ;;  %s531_s27 = scalar_lea.hbm %s773_s22, 256 }
  0x1c   : > { %p532_p1 = scmp.ne.s32.totalorder %s773_s22, %s531_s27  ;;  %p533_p2 = pneg %p777_p0 }
  0x1d   : > { %s536_s4 = scalar_lea.hbm %s894_s0, 1024  ;;  %p537_p3 = scmp.lt.u32.totalorder %s773_s22, %s894_s0 }
  0x1e   : > { %p534_p4 = pnand %p533_p2, %p532_p1  ;;  %p538_p6 = scmp.lt.u32.totalorder %s536_s4, %s531_s27 }
  0x1f   : > { %p540_p10 = scmp.lt.u32.totalorder %s531_s27, %s773_s22 }
  0x20   : > { %p535_p5 = pneg %p534_p4  ;;  %p539_p7 = por %p538_p6, %p537_p3 }
  0x22   : > { %p541_p11 = por %p540_p10, %p539_p7 }
  0x24   : > { %p542_p13 = pnand %p541_p11, %p535_p5 }
  0x26   : > { %545 = shalt.err (!%p542_p13)
}
  0x27   : > { %s546_s29 = scalar_lea.vmem %s768_s7, 256  ;;  %s661_s8 = smov [#allocation2]  }
  0x28   : > { %p547_p1 = scmp.ne.s32.totalorder %s768_s7, %s546_s29  ;;  %s551_s17 = sshll.u32 %s661_s8, 4  ;;  %s552_s17 = int_to_ptr.vmem [resolvable:$false] %s551_s17 }
  0x29   : > { %s553_s18 = scalar_lea.vmem %s552_s17, 512  ;;  %p554_p9 = scmp.lt.s32.totalorder %s768_s7, %s552_s17 }
  0x2a   : > { %p549_p4 = pnand %p547_p1, %p533_p2  ;;  %p555_p3 = scmp.lt.s32.totalorder %s553_s18, %s546_s29 }
  0x2c   : > { %p550_p12 = pneg %p549_p4  ;;  %p556_p6 = por %p555_p3, %p554_p9 }
  0x2e   : > { %p557_p7 = pnand %p556_p6, %p550_p12 }
  0x30   : > { %560 = shalt.err (!%p557_p7)
}
  0x31   : > { %s662_s27 = smov 128   ;;  %s663_s23 = smov 64  }
  0x32   : > { %s664_s3 = smov 4   ;;  %p400_p2 = scmp.ge.s32.totalorder %s659_s16, 1 }
  0x33   : > { %447 = dma.hbm_to_vmem [thread:$0]  (!%p777_p0), %s773_s22, 256, %s768_s7, %s781_s26, %s662_s27, %s663_s23, %s664_s3  }
  0x34   : > { %p148_p5 = scmp.lt.s32.totalorder %s659_s16, 5 }
  0x36   : > { %p149_p10 = pnand %p400_p2, %p148_p5 }
  0x37   : > { %s812_s4 = sand.u32 (!%p149_p10), 1, %s635_s10  }
  0x38   : > { %152 = sbr.rel (%p149_p10) target bundleno = 312 (0x138), region = 28  ;;  %s401_s5 = sshll.u32 (!%p149_p10), %s812_s4, 4 }
  0x39   : > { %s155_s6 = scalar_lea.sflag (!%p149_p10), [#allocation3], %s812_s4  ;;  %s158_s29 = scalar_lea.vmem (!%p149_p10), [#allocation2], %s401_s5 }
  0x3f   : > { %622 = dma.done.wait (%p747_p8), %s155_s6, 256  }
  0x40   : > { %624 = vsyncadd (%p747_p8), %s155_s6, 4294967040  ;;  %v665_v0 = vmov 0.0   ;;  %vm666_vm0 = vmmov 0   ;;  %v526_v1 = vld [vmem:[%s158_s29] sm:$0xff]   ;;  %v527_v2 = vld [vmem:[%s158_s29 + $0x8] sm:$0xff]   ;;  %vm217_vm1 = vcmask 261120  }
  0x41   : > { %434 = vmatprep.subr.bf16.mxu1 %v665_v0  ;;  %418 = vmatprep.subr.bf16.mxu0 %v665_v0  ;;  %v528_v3 = vld [vmem:[%s895_s1 + $0x8] sm:$0xff]   ;;  %v529_v4 = vld [vmem:[%s895_s1] sm:$0xff]   ;;  %v530_v5 = vld [vmem:[%s895_s1 + $0x10] sm:$0xff]   ;;  %s438_s17 = smul.u32 48, %s812_s4  ;;  %p903_p9 = scmp.ne.s32.totalorder %s900_s25, 0 }
  0x42   : > { %426 = vmatprep.mubr.msk.bf16.mxu1 %vm666_vm0, %v665_v0  ;;  %422 = vmatprep.mubr.msk.bf16.mxu0 %vm666_vm0, %v665_v0  ;;  %s439_s18 = smul.u32 12, %s647_s13  ;;  %s667_s22 = smov [#allocation5]  }
  0x43   : > { %436 = vmatpush3.bf16.msra.mxu1 %v526_v1  ;;  %419 = vmatpush3.bf16.msra.mxu0 %v526_v1  ;;  %s178_s27 = scalar_lea.vmem [#allocation5], %s438_s17  ;;  %s565_s24 = sshll.u32 %s667_s22, 4  ;;  %s566_s24 = int_to_ptr.vmem [resolvable:$false] %s565_s24 }
  0x44   : > { %435 = vmatprep.subr.bf16.mxu1 %v665_v0  ;;  %420 = vmatprep.subr.bf16.mxu0 %v665_v0  ;;  %s302_s23 = sadd.s32 %s643_s12, %s439_s18  ;;  %s305_s3 = sshll.u32 %s178_s27, 4  ;;  %s835_s3 = int_to_ptr.vmem [resolvable:$true] %s305_s3 }
  0x45   : > { %s410_s5 = sshll.u32 %s302_s23, 7  ;;  %s291_s12 = scalar_lea.sflag [#allocation4], %s812_s4 }
  0x46   : > { %s840_s29 = scalar_lea.hbm %s896_s2, %s410_s5  ;;  %s561_s7 = scalar_lea.vmem %s835_s3, 768 }
  0x47   : > { %437 = vmatpush3.bf16.msra.mxu1 %v527_v2  ;;  %421 = vmatpush3.bf16.msra.mxu0 %v527_v2  ;;  %p562_p8 = scmp.ne.s32.totalorder %s835_s3, %s561_s7  ;;  %s567_s21 = scalar_lea.vmem %s566_s24, 1536 }
  0x48   : > { %p568_p11 = scmp.lt.s32.totalorder %s835_s3, %s566_s24  ;;  %p569_p13 = scmp.lt.s32.totalorder %s567_s21, %s561_s7 }
  0x49   : > { %p563_p12 = pnand %p562_p8, %p903_p9 }
  0x4a   : > { %427 = vmatmul.mubr.msk.bf16.vlgmr.msra.gmra.mrb[0].mxu1 %vm217_vm1, %v528_v3  ;;  %423 = vmatmul.mubr.msk.bf16.vlgmr.msra.gmra.mrb[0].mxu0 %vm217_vm1, %v529_v4  ;;  %p570_p1 = por %p569_p13, %p568_p11 }
  0x4b   : > { %430 = vmatprep.mubr.msk.bf16.mxu1 %vm666_vm0, %v665_v0  ;;  %p564_p0 = pneg %p563_p12 }
  0x4d   : > { %p571_p4 = pnand %p570_p1, %p564_p0 }
  0x52   : > { %431 = vmatmul.mubr.msk.bf16.gmra.mrb[4].mxu1 %vm217_vm1, %v530_v5 }
 0x11d   : > { %v269_v6 = vpop.f32.mrb[0].mxu1  ;;  %v261_v7 = vpop.f32.mrb[0].mxu0 }
 0x11e   : > { %286 = vst [vmem:[%s178_s27 + $0x10] sm:$0xff] %v269_v6  ;;  %v428_v8 = vpop.f32.mrb[1].mxu1  ;;  %284 = vst [vmem:[%s178_s27] sm:$0xff] %v261_v7  ;;  %v424_v9 = vpop.f32.mrb[1].mxu0 }
 0x11f   : > { %v272_v10 = vpop.f32.mrb[2].mxu1  ;;  %v264_v11 = vpop.f32.mrb[2].mxu0 }
 0x120   : > { %287 = vst [vmem:[%s178_s27 + $0x18] sm:$0xff] %v272_v10  ;;  %v429_v12 = vpop.f32.mrb[3].mxu1  ;;  %285 = vst [vmem:[%s178_s27 + $0x8] sm:$0xff] %v264_v11  ;;  %v425_v13 = vpop.f32.mrb[3].mxu0 }
 0x125   : > { %v277_v14 = vpop.f32.mrb[4].mxu1 }
 0x126   : > { %288 = vst [vmem:[%s178_s27 + $0x20] sm:$0xff] %v277_v14  ;;  %v432_v15 = vpop.f32.mrb[5].mxu1 }
 0x127   : > { %v280_v16 = vpop.f32.mrb[6].mxu1 }
 0x128   : > { %289 = vst [vmem:[%s178_s27 + $0x28] sm:$0xff] %v280_v16  ;;  %v433_v17 = vpop.f32.mrb[7].mxu1 }
 0x129   : > { %574 = shalt.err (!%p571_p4)
}
 0x12a   : > { %s575_s26 = scalar_lea.hbm %s840_s29, 768  ;;  %s579_s18 = scalar_lea.hbm %s896_s2, 3072 }
 0x12b   : > { %p576_p3 = scmp.ne.s32.totalorder %s840_s29, %s575_s26  ;;  %p580_p2 = scmp.lt.u32.totalorder %s840_s29, %s896_s2 }
 0x12c   : > { %p581_p5 = scmp.lt.u32.totalorder %s579_s18, %s575_s26  ;;  %p583_p8 = scmp.lt.u32.totalorder %s575_s26, %s840_s29 }
 0x12d   : > { %p577_p6 = pnand %p576_p3, %p903_p9 }
 0x12e   : > { %p582_p10 = por %p581_p5, %p580_p2 }
 0x12f   : > { %p578_p7 = pneg %p577_p6 }
 0x130   : > { %p584_p12 = por %p583_p8, %p582_p10 }
 0x132   : > { %p585_p0 = pnand %p584_p12, %p578_p7 }
 0x134   : > { %588 = shalt.err (!%p585_p0)
}
 0x135   : > { %s668_s5 = smov 128   ;;  %s669_s13 = smov 256  }
 0x136   : > { %s670_s6 = smov 8  }
 0x137   : > { %442 = dma.vmem_to_hbm [thread:$0]  (%p903_p9), %s835_s3, 768, %s840_s29, %s291_s12, %s668_s5, %s669_s13, %s670_s6  }
 0x138 PF: > { %p453_p11 = scmp.ge.s32.totalorder %s659_s16, 2  ;;  %s320_s7 = sand.u32 1, %s631_s9  }
 0x139   : > { %p904_p13 = scmp.ne.s32.totalorder %s901_s28, 0  ;;  %s321_s22 = scalar_lea.sflag [#allocation4], %s320_s7 }
 0x13b   : > { %p449_p1 = pnand %p453_p11, %p904_p13 }
 0x13d   : > { %626 = dma.done.wait (!%p449_p1), %s321_s22, 768  }
 0x13e   : > { %628 = vsyncadd (!%p449_p1), %s321_s22, 4294966528  ;;  %s18_s16 = sadd.s32 1, %s659_s16   ;;  %s905_s9 = smov %s635_s10 }
 0x13f   : > { %p15_p4 = scmp.ge.s32.totalorder %s18_s16, 6   ;;  %s906_s10 = smov %s639_s11 }
 0x140   : > { %s907_s11 = smov %s764_s30  ;;  %s908_s12 = smov %s651_s14 }
 0x141   : > { %s909_s13 = smov %s655_s15  ;;  %s910_s14 = smov %s913_s19 }
 0x142   : > { %s911_s15 = smov %s917_s20  ;;  %17 = sbr.rel (!%p15_p4) target bundleno = 7 (0x7), region = 73 }
 0x149   :  { %326 = vsyncpa [#allocation3], 1 }
 0x14a   :  { %328 = vsyncpa [#allocation3 + $0x1], 1 }
 0x14b   :  { %329 = vsyncpa [#allocation4], 1 }
 0x14c   :  { %331 = vsyncpa [#allocation4 + $0x1], 1 }

</bundles_post_ra>
